<compile_context>
chip_gen: v7x
topology: tpu7x:2x2x1
jax: 0.10.0
libtpu: 0.0.40
codegen_flags: <defaults>
</compile_context>

<pallas_src>
import functools

import jax
import jax.numpy as jnp
import numpy as np
from jax.experimental import pallas as pl
from jax.experimental.pallas import tpu as pltpu

# ------------------------- small synthetic config -------------------------
BATCH = 2
NUM_CAMS = 6
NUM_CLS_TOKENS = 4
RGB_EMBED_DIM = 32          # stands in for rgb_encoder.config.hidden_size
RGB_FFN_DIM = 64            # stands in for rgb_encoder.config.intermediate_size
RGB_ENC_LAYERS = 5          # number of hidden-state blocks we keep (>= NUM_CLS_TOKENS)
RGB_SEQ = 10                # ViT tokens per camera view (CLS token at index 0)
LIDAR_EMBED_DIM = 32        # stands in for 384
LIDAR_FFN_DIM = 4 * LIDAR_EMBED_DIM
LIDAR_SEQ = 8
LLM_EMBED_DIM = 32
LLM_NUM_HEADS = 4
LLM_HEAD_DIM = LLM_EMBED_DIM // LLM_NUM_HEADS
LLM_NUM_LAYERS = 6
BACKWARD_DEPTH = 4
LINKER_TEMPERATURE = 1.0
TEXT_SEQ = 8


# ------------------------- per-chip operand dtype -------------------------
def _pick_operand_dtype():
    """bf16 operands on bf16-native MXU/VPU chips (v6e / v7x); f32 elsewhere (v5e and older
    have no bf16 VPU, so bf16 activations would force cast pairs around every vector op)."""
    try:
        kind = jax.devices()[0].device_kind.lower()
    except Exception:
        return jnp.float32
    if ("v6" in kind) or ("v7" in kind) or ("7x" in kind):
        return jnp.bfloat16
    return jnp.float32


_OPERAND_DTYPE = _pick_operand_dtype()


# ------------------------- GELU (PyTorch nn.GELU() is erf-exact) -------------------------
def _erf_lowers_in_pallas() -> bool:
    """Trace+lower (NO device compile, NO execution) a tiny erf kernel to check whether
    lax.erf has a Pallas/Mosaic lowering on this jax build."""
    def k(x_ref, o_ref):
        o_ref[...] = jax.lax.erf(x_ref[...])
    f = pl.pallas_call(k, out_shape=jax.ShapeDtypeStruct((8, 128), jnp.float32))
    try:
        jax.jit(f).lower(jax.ShapeDtypeStruct((8, 128), jnp.float32))
        return True
    except Exception:
        return False


_ERF_OK = _erf_lowers_in_pallas()


def _gelu(x):
    if _ERF_OK:
        # exact GELU, matches torch.nn.GELU() default (approximate='none')
        return 0.5 * x * (1.0 + jax.lax.erf(x * 0.7071067811865476))
    # TODO(synk): erf not lowerable by Mosaic on this jax build; tanh-approx GELU fallback
    # (PyTorch nn.GELU() default is erf-exact; ~1e-3 relative difference on activations).
    c = 0.7978845608028654  # sqrt(2/pi)
    return 0.5 * x * (1.0 + jnp.tanh(c * (x + 0.044715 * x * x * x)))


# ------------------------- the single fused Pallas kernel -------------------------
def _fused_aligner_linker_kernel(n_rgb, depth,
                                 scale_ref,            # (1, depth*2E) f32, lane-dense
                                 x_ref,                # (n_tot, d_in)       operand dtype
                                 w1r_ref, w2r_ref,     # rgb  slabs [W ; b]  operand dtype
                                 w1l_ref, w2l_ref,     # lidar slabs [W ; b] operand dtype
                                 out_ref):             # (n_tot, depth*2E)   f32
    n_tot, d_in = x_ref.shape

    def packed_mlp(x_mod, w1_slab, w2_slab):
        # slab layout: rows [0 : rows-1] = weight, last row = bias (single DMA per slab)
        w1 = w1_slab[0:d_in, :]
        b1 = w1_slab[d_in:d_in + 1, :].astype(jnp.float32)
        # GELU + accumulation stay f32 on every chip (v5e VPU/EUP have no bf16)
        h = _gelu(jnp.dot(x_mod, w1, preferred_element_type=jnp.float32) + b1)
        ffn = w2_slab.shape[0] - 1
        w2 = w2_slab[0:ffn, :]
        b2 = w2_slab[ffn:ffn + 1, :].astype(jnp.float32)
        return jnp.dot(h.astype(w2.dtype), w2, preferred_element_type=jnp.float32) + b2

    # rgb tokens -> packed [key | value]; lidar tokens -> packed [key | value]
    kv_r = packed_mlp(x_ref[0:n_rgb, :], w1r_ref, w2r_ref)        # (n_rgb, 2E)
    kv_l = packed_mlp(x_ref[n_rgb:n_tot, :], w1l_ref, w2l_ref)    # (n_lid, 2E)
    kv = jnp.concatenate([kv_r, kv_l], axis=0)                    # (n_tot, 2E) f32

    # Linker epilogue: ONE unmasked lane-dense store.  Column block d of the output is
    # kv * sigmoid(w_d / T); the per-depth scale arrives pre-expanded as a (1, depth*2E)
    # f32 row, so the epilogue is a single vmul + single full-tile vst (no masked partial
    # stores at lane offsets 64/192, no SMEM scalar->vector broadcasts).
    kv_tiled = jnp.concatenate([kv] * depth, axis=1)              # (n_tot, depth*2E)
    out_ref[...] = kv_tiled * scale_ref[...]


def _full_spec(shape):
    nd = len(shape)
    return pl.BlockSpec(shape, lambda i, _nd=nd: (0,) * _nd)


def fused_aligner_linker(x_slab, rgb_slabs, lidar_slabs, scale_row, n_rgb):
    """One pallas_call, grid=(1,): all four aligner MLPs + linker scaling.

    Returns (n_rgb + n_lidar, BACKWARD_DEPTH * 2 * LLM_EMBED_DIM) where
    columns [d*2E : d*2E+E] = key * s_d and [d*2E+E : (d+1)*2E] = value * s_d.
    """
    n_tot = x_slab.shape[0]
    out_w = scale_row.shape[1]
    depth = out_w // (2 * LLM_EMBED_DIM)
    w1r, w2r = rgb_slabs
    w1l, w2l = lidar_slabs

    kernel = functools.partial(_fused_aligner_linker_kernel, n_rgb, depth)
    operands = (scale_row, x_slab, w1r, w2r, w1l, w2l)   # 6 input DMAs total

    return pl.pallas_call(
        kernel,
        out_shape=jax.ShapeDtypeStruct((n_tot, out_w), jnp.float32),
        grid_spec=pltpu.PrefetchScalarGridSpec(
            num_scalar_prefetch=0,
            grid=(1,),   # single step: whole problem (<1 MiB) fits VMEM on every generation
            in_specs=[_full_spec(op.shape) for op in operands],
            out_specs=_full_spec((n_tot, out_w)),   # lane-dense 256-wide output slab
        ),
        # 64-row problem: keep a single TensorCore (splitting would be pure overhead on v7x)
        compiler_params=pltpu.CompilerParams(dimension_semantics=("arbitrary",)),
    )(*operands)


# ------------------------- parameters (deterministic in-script init) -------------------------
def _init_aligner(key, d_in, d_ffn, d_out):
    k1, k2, k3, k4 = jax.random.split(key, 4)
    bound1 = 1.0 / np.sqrt(d_in)
    bound2 = 1.0 / np.sqrt(d_ffn)
    return (
        jax.random.normal(k1, (d_in, d_ffn), jnp.float32) * 0.02,
        jax.random.uniform(k2, (1, d_ffn), jnp.float32, minval=-bound1, maxval=bound1),
        jax.random.normal(k3, (d_ffn, d_out), jnp.float32) * 0.02,
        jax.random.uniform(k4, (1, d_out), jnp.float32, minval=-bound2, maxval=bound2),
    )


def init_params(key):
    keys = jax.random.split(key, 5)
    return {
        "rgb_key": _init_aligner(keys[0], RGB_EMBED_DIM, RGB_FFN_DIM, LLM_EMBED_DIM),
        "rgb_value": _init_aligner(keys[1], RGB_EMBED_DIM, RGB_FFN_DIM, LLM_EMBED_DIM),
        "lidar_key": _init_aligner(keys[2], LIDAR_EMBED_DIM, LIDAR_FFN_DIM, LLM_EMBED_DIM),
        "lidar_value": _init_aligner(keys[3], LIDAR_EMBED_DIM, LIDAR_FFN_DIM, LLM_EMBED_DIM),
        # nn.init.uniform_(linker_weights, a=-1.0, b=1.0)
        "linker_weights": jax.random.uniform(
            keys[4], (BACKWARD_DEPTH,), jnp.float32, minval=-1.0, maxval=1.0
        ),
    }


def _pack_modality_slabs(key_p, value_p, d_in_pad, dtype):
    """Pack one modality's key+value aligner weights into TWO slabs (bias = last row):

      slab1 (d_in_pad+1, 2*ffn) = [[W1_key | W1_value] ; [b1_key | b1_value]]
      slab2 (2*ffn+1,    2*E)   = [[W2_key 0 ; 0 W2_value] ; [b2_key | b2_value]]

    W1 side-by-side + W2 block-diagonal keeps the math exact (zero off-blocks) while letting
    both aligners run as one dot per stage; packing the bias into the weight slab cuts the
    input-DMA count.  Tiny concats, done once per forward by XLA.
    """
    w1k, b1k, w2k, b2k = key_p
    w1v, b1v, w2v, b2v = value_p
    d_in = w1k.shape[0]
    w1 = jnp.concatenate([w1k, w1v], axis=1)                       # (d_in, 2*ffn)
    if d_in_pad > d_in:
        # zero weight rows for the zero-padded x columns: exact
        w1 = jnp.concatenate(
            [w1, jnp.zeros((d_in_pad - d_in, w1.shape[1]), w1.dtype)], axis=0)
    b1 = jnp.concatenate([b1k, b1v], axis=1)                       # (1, 2*ffn)
    slab1 = jnp.concatenate([w1, b1], axis=0).astype(dtype)        # (d_in_pad+1, 2*ffn)
    w2 = jnp.concatenate(
        [jnp.concatenate([w2k, jnp.zeros_like(w2k)], axis=1),
         jnp.concatenate([jnp.zeros_like(w2v), w2v], axis=1)], axis=0)   # (2*ffn, 2*E)
    b2 = jnp.concatenate([b2k, b2v], axis=1)                       # (1, 2*E)
    slab2 = jnp.concatenate([w2, b2], axis=0).astype(dtype)        # (2*ffn+1, 2*E)
    return slab1, slab2


# ------------------------- forward (hot path = 1 Pallas launch, rest is layout plumbing) ----
def forward(params, cam_hidden_states, lidar_tokens,
            text_input_ids=None, text_attention_mask=None, text_labels=None):
    # TODO(synk): rgb_encoder / lidar_encoder / llm_backbone are external pretrained HF
    # modules (frozen) with unspecified architectures; their outputs are taken as inputs
    # here and the final llm_backbone(..., past_key_values=...) call is not translated.
    #
    # cam_hidden_states: (NUM_CAMS, RGB_ENC_LAYERS, B, RGB_SEQ, RGB_EMBED_DIM)
    #   == per-camera hidden_states of the rgb encoder (CLS token at seq index 0).
    # lidar_tokens: (B, LIDAR_SEQ, LIDAR_EMBED_DIM) == lidar_encoder(lidar_top).

    # per camera: take CLS token of the last NUM_CLS_TOKENS blocks, then cat over cameras
    cls = cam_hidden_states[:, -NUM_CLS_TOKENS:, :, 0, :]          # (6, 4, B, d_rgb)
    batch_size = cam_hidden_states.shape[2]
    rgb_tokens = jnp.transpose(cls, (2, 0, 1, 3)).reshape(
        batch_size, NUM_CAMS * NUM_CLS_TOKENS, RGB_EMBED_DIM)      # (B, 24, d_rgb)

    s_rgb = rgb_tokens.shape[1]
    s_lidar = lidar_tokens.shape[1]
    s_tot = s_rgb + s_lidar

    x_rgb = rgb_tokens.reshape(-1, RGB_EMBED_DIM)                  # (B*24, d_rgb)
    x_lid = lidar_tokens.reshape(-1, LIDAR_EMBED_DIM)              # (B*8,  d_lidar)
    n_rgb = x_rgb.shape[0]
    n_lid = x_lid.shape[0]

    # ONE activation slab (rgb rows then lidar rows), columns zero-padded to a common d_in
    # (no-op here since both embed dims are 32); rows 48 / 16 are both sublane-aligned.
    d_in_pad = max(RGB_EMBED_DIM, LIDAR_EMBED_DIM)

    def pad_cols(x):
        pad = d_in_pad - x.shape[1]
        return x if pad == 0 else jnp.pad(x, ((0, 0), (0, pad)))

    x_slab = jnp.concatenate([pad_cols(x_rgb), pad_cols(x_lid)],
                             axis=0).astype(_OPERAND_DTYPE)        # (n_tot, d_in_pad)

    rgb_slabs = _pack_modality_slabs(params["rgb_key"], params["rgb_value"],
                                     d_in_pad, _OPERAND_DTYPE)
    lidar_slabs = _pack_modality_slabs(params["lidar_key"], params["lidar_value"],
                                       d_in_pad, _OPERAND_DTYPE)

    # lane-dense linker scale row: column c -> sigmoid(w_{c // 2E} / T)
    cw = jax.nn.sigmoid(params["linker_weights"] / LINKER_TEMPERATURE)
    scale_row = jnp.repeat(cw, 2 * LLM_EMBED_DIM).reshape(1, -1).astype(jnp.float32)

    # single fused Pallas launch: (B*(24+8), DEPTH * 2*E) = (64, 256)
    out = fused_aligner_linker(x_slab, rgb_slabs, lidar_slabs, scale_row, n_rgb)

    # ---- pure layout plumbing below (cheap XLA reshapes/transposes) ----
    E, H, Dh = LLM_EMBED_DIM, LLM_NUM_HEADS, LLM_HEAD_DIM
    kv = out.reshape(n_rgb + n_lid, BACKWARD_DEPTH, 2 * E)
    kv = jnp.transpose(kv, (1, 0, 2))                              # (D, N_tot, 2E)

    def to_mh(x, seq):                                             # (D, B*seq, E)->(D,B,H,seq,Dh)
        x = x.reshape(BACKWARD_DEPTH, batch_size, seq, H, Dh)
        return jnp.transpose(x, (0, 1, 3, 2, 4))

    rgb_key = to_mh(kv[:, :n_rgb, :E], s_rgb)
    rgb_value = to_mh(kv[:, :n_rgb, E:], s_rgb)
    lidar_key = to_mh(kv[:, n_rgb:, :E], s_lidar)
    lidar_value = to_mh(kv[:, n_rgb:, E:], s_lidar)

    mm_key = jnp.concatenate([rgb_key, lidar_key], axis=3)         # (D, B, H, S_tot, Dh)
    mm_value = jnp.concatenate([rgb_value, lidar_value], axis=3)
    #   .view(-1, S, Dh).transpose(1, 2)   /   .view(-1, S, Dh)
    mm_key = jnp.transpose(
        mm_key.reshape(BACKWARD_DEPTH, batch_size * H, s_tot, Dh), (0, 1, 3, 2))
    mm_value = mm_value.reshape(BACKWARD_DEPTH, batch_size * H, s_tot, Dh)

    # one shared zero KV pair for all untrainable layers (identical values; avoids
    # materializing (LLM_NUM_LAYERS - BACKWARD_DEPTH) separate full-size buffers)
    zeros_k = jnp.zeros((batch_size * H, Dh, s_tot), jnp.float32)
    zeros_v = jnp.zeros((batch_size * H, s_tot, Dh), jnp.float32)
    mm_key_values = [(zeros_k, zeros_v)] * (LLM_NUM_LAYERS - BACKWARD_DEPTH)
    mm_key_values += [(mm_key[d], mm_value[d]) for d in range(BACKWARD_DEPTH)]
    return mm_key_values


# ------------------------- unfused pure-JAX reference (for validation only) ------------------
def _reference_forward(params, cam_hidden_states, lidar_tokens):
    # Mirrors the kernel's operand dtype (bf16 on v6e/v7x, f32 on v5e) with f32 accumulation,
    # so the check validates the fusion / slab packing / linker epilogue, not quantization.
    dtype = _OPERAND_DTYPE

    def mlp(x, p):
        w1, b1, w2, b2 = p
        h = _gelu(jnp.dot(x.astype(dtype), w1.astype(dtype),
                          preferred_element_type=jnp.float32)
                  + b1.astype(dtype).astype(jnp.float32))
        return (jnp.dot(h.astype(dtype), w2.astype(dtype),
                        preferred_element_type=jnp.float32)
                + b2.astype(dtype).astype(jnp.float32))

    cls = cam_hidden_states[:, -NUM_CLS_TOKENS:, :, 0, :]
    b = cam_hidden_states.shape[2]
    rgb_tokens = jnp.transpose(cls, (2, 0, 1, 3)).reshape(
        b, NUM_CAMS * NUM_CLS_TOKENS, RGB_EMBED_DIM)
    s_rgb, s_lid = rgb_tokens.shape[1], lidar_tokens.shape[1]
    H, Dh, E = LLM_NUM_HEADS, LLM_HEAD_DIM, LLM_EMBED_DIM

    def to_mh(x, seq):                                             # (B, seq, E) -> (B, H, seq, Dh)
        return jnp.transpose(x.reshape(b, seq, H, Dh), (0, 2, 1, 3))

    rgb_flat = rgb_tokens.reshape(-1, RGB_EMBED_DIM)
    lid_flat = lidar_tokens.reshape(-1, LIDAR_EMBED_DIM)
    rk = to_mh(mlp(rgb_flat, params["rgb_key"]).reshape(b, s_rgb, E), s_rgb)
    rv = to_mh(mlp(rgb_flat, params["rgb_value"]).reshape(b, s_rgb, E), s_rgb)
    lk = to_mh(mlp(lid_flat, params["lidar_key"]).reshape(b, s_lid, E), s_lid)
    lv = to_mh(mlp(lid_flat, params["lidar_value"]).reshape(b, s_lid, E), s_lid)
    mm_key = jnp.concatenate([rk, lk], axis=2)
    mm_value = jnp.concatenate([rv, lv], axis=2)
    s_tot = s_rgb + s_lid
    mm_key = jnp.transpose(mm_key.reshape(b * H, s_tot, Dh), (0, 2, 1))
    mm_value = mm_value.reshape(b * H, s_tot, Dh)
    cw = jax.nn.sigmoid(params["linker_weights"] / LINKER_TEMPERATURE)
    zk, zv = jnp.zeros_like(mm_key), jnp.zeros_like(mm_value)
    return ([(zk, zv)] * (LLM_NUM_LAYERS - BACKWARD_DEPTH)
            + [(mm_key * cw[d], mm_value * cw[d]) for d in range(BACKWARD_DEPTH)])


# ------------------------- main -------------------------
if __name__ == "__main__":
    root = jax.random.PRNGKey(0)
    k_params, k_cam, k_lidar, k_text = jax.random.split(root, 4)

    params = init_params(k_params)
    cam_hidden_states = jax.random.normal(
        k_cam, (NUM_CAMS, RGB_ENC_LAYERS, BATCH, RGB_SEQ, RGB_EMBED_DIM), jnp.float32)
    lidar_tokens = jax.random.normal(
        k_lidar, (BATCH, LIDAR_SEQ, LIDAR_EMBED_DIM), jnp.float32)
    text_input_ids = jax.random.randint(k_text, (BATCH, TEXT_SEQ), 0, 100)
    text_attention_mask = jnp.ones((BATCH, TEXT_SEQ), jnp.int32)
    text_labels = text_input_ids

    fwd = jax.jit(forward)
    past_key_values = fwd(params, cam_hidden_states, lidar_tokens,
                          text_input_ids, text_attention_mask, text_labels)
    jax.block_until_ready(past_key_values)

    # sanity: correct structure / shapes of the produced KV cache
    assert len(past_key_values) == LLM_NUM_LAYERS
    s_total = NUM_CAMS * NUM_CLS_TOKENS + LIDAR_SEQ
    k_last, v_last = past_key_values[-1]
    assert k_last.shape == (BATCH * LLM_NUM_HEADS, LLM_HEAD_DIM, s_total)
    assert v_last.shape == (BATCH * LLM_NUM_HEADS, s_total, LLM_HEAD_DIM)

    # numerical check of the fused kernel against the unfused pure-JAX reference
    ref = jax.jit(_reference_forward)(params, cam_hidden_states, lidar_tokens)
    jax.block_until_ready(ref)
    rtol, atol = (1e-2, 2e-4) if _OPERAND_DTYPE == jnp.float32 else (1e-2, 5e-4)
    for (k_p, v_p), (k_r, v_r) in zip(past_key_values, ref):
        np.testing.assert_allclose(np.asarray(k_p), np.asarray(k_r), rtol=rtol, atol=atol)
        np.testing.assert_allclose(np.asarray(v_p), np.asarray(v_r), rtol=rtol, atol=atol)

    print("KERNEL_OK")
</pallas_src>

<mosaic_0001>
module attributes {stable_mosaic.version = 11 : i64} {
  func.func @_fused_aligner_linker_kernel(%arg0: i32, %arg1: memref<1x256xf32, #tpu.memory_space<vmem>>, %arg2: memref<64x32xf32, #tpu.memory_space<vmem>>, %arg3: memref<33x128xf32, #tpu.memory_space<vmem>>, %arg4: memref<129x64xf32, #tpu.memory_space<vmem>>, %arg5: memref<33x256xf32, #tpu.memory_space<vmem>>, %arg6: memref<257x64xf32, #tpu.memory_space<vmem>>, %arg7: memref<64x256xf32, #tpu.memory_space<vmem>>) attributes {dimension_semantics = [#tpu.dimension_semantics<arbitrary>], iteration_bounds = array<i64: 1>, scalar_prefetch = 0 : i64, scratch_operands = 0 : i64, tpu.core_type = #tpu.core_type<tc>, window_params = [{pipeline_mode = #tpu.pipeline_mode<synchronous>, transform_indices = @transform_0, window_bounds = array<i64: 1, 256>}, {pipeline_mode = #tpu.pipeline_mode<synchronous>, transform_indices = @transform_1, window_bounds = array<i64: 64, 32>}, {pipeline_mode = #tpu.pipeline_mode<synchronous>, transform_indices = @transform_2, window_bounds = array<i64: 33, 128>}, {pipeline_mode = #tpu.pipeline_mode<synchronous>, transform_indices = @transform_3, window_bounds = array<i64: 129, 64>}, {pipeline_mode = #tpu.pipeline_mode<synchronous>, transform_indices = @transform_4, window_bounds = array<i64: 33, 256>}, {pipeline_mode = #tpu.pipeline_mode<synchronous>, transform_indices = @transform_5, window_bounds = array<i64: 257, 64>}, {pipeline_mode = #tpu.pipeline_mode<synchronous>, transform_indices = @transform_6, window_bounds = array<i64: 64, 256>}]} {
    %c0 = arith.constant 0 : index
    %c0_0 = arith.constant 0 : index
    %0 = vector.load %arg2[%c0, %c0_0] : memref<64x32xf32, #tpu.memory_space<vmem>>, vector<48x32xf32>
    %c0_1 = arith.constant 0 : index
    %c0_2 = arith.constant 0 : index
    %1 = vector.load %arg3[%c0_1, %c0_2] : memref<33x128xf32, #tpu.memory_space<vmem>>, vector<32x128xf32>
    %c32 = arith.constant 32 : index
    %c0_3 = arith.constant 0 : index
    %2 = vector.load %arg3[%c32, %c0_3] : memref<33x128xf32, #tpu.memory_space<vmem>>, vector<1x128xf32>
    %cst = arith.constant dense<0.000000e+00> : vector<48x128xf32>
    %3 = tpu.matmul %0, %1, %cst {dimension_numbers = #tpu.dot_dimension_numbers<[1], [0], [0], [1], [0, 0, 1, 1], [], []>} : vector<48x32xf32>, vector<32x128xf32>, vector<48x128xf32> -> vector<48x128xf32>
    %4 = vector.broadcast %2 : vector<1x128xf32> to vector<48x128xf32>
    %5 = arith.addf %3, %4 : vector<48x128xf32>
    %cst_4 = arith.constant 5.000000e-01 : f32
    %6 = vector.broadcast %cst_4 : f32 to vector<48x128xf32>
    %7 = arith.mulf %6, %5 : vector<48x128xf32>
    %cst_5 = arith.constant 4.471500e-02 : f32
    %8 = vector.broadcast %cst_5 : f32 to vector<48x128xf32>
    %9 = arith.mulf %8, %5 : vector<48x128xf32>
    %10 = arith.mulf %9, %5 : vector<48x128xf32>
    %11 = arith.mulf %10, %5 : vector<48x128xf32>
    %12 = arith.addf %5, %11 : vector<48x128xf32>
    %cst_6 = arith.constant 0.797884583 : f32
    %13 = vector.broadcast %cst_6 : f32 to vector<48x128xf32>
    %14 = arith.mulf %13, %12 : vector<48x128xf32>
    %15 = math.tanh %14 : vector<48x128xf32>
    %cst_7 = arith.constant 1.000000e+00 : f32
    %16 = vector.broadcast %cst_7 : f32 to vector<48x128xf32>
    %17 = arith.addf %16, %15 : vector<48x128xf32>
    %18 = arith.mulf %7, %17 : vector<48x128xf32>
    %c0_8 = arith.constant 0 : index
    %c0_9 = arith.constant 0 : index
    %19 = vector.load %arg4[%c0_8, %c0_9] : memref<129x64xf32, #tpu.memory_space<vmem>>, vector<128x64xf32>
    %c128 = arith.constant 128 : index
    %c0_10 = arith.constant 0 : index
    %20 = vector.load %arg4[%c128, %c0_10] : memref<129x64xf32, #tpu.memory_space<vmem>>, vector<1x64xf32>
    %cst_11 = arith.constant dense<0.000000e+00> : vector<48x64xf32>
    %21 = tpu.matmul %18, %19, %cst_11 {dimension_numbers = #tpu.dot_dimension_numbers<[1], [0], [0], [1], [0, 0, 1, 1], [], []>} : vector<48x128xf32>, vector<128x64xf32>, vector<48x64xf32> -> vector<48x64xf32>
    %22 = vector.broadcast %20 : vector<1x64xf32> to vector<48x64xf32>
    %23 = arith.addf %21, %22 : vector<48x64xf32>
    %c48 = arith.constant 48 : index
    %c0_12 = arith.constant 0 : index
    %24 = vector.load %arg2[%c48, %c0_12] : memref<64x32xf32, #tpu.memory_space<vmem>>, vector<16x32xf32>
    %c0_13 = arith.constant 0 : index
    %c0_14 = arith.constant 0 : index
    %25 = vector.load %arg5[%c0_13, %c0_14] : memref<33x256xf32, #tpu.memory_space<vmem>>, vector<32x256xf32>
    %c32_15 = arith.constant 32 : index
    %c0_16 = arith.constant 0 : index
    %26 = vector.load %arg5[%c32_15, %c0_16] : memref<33x256xf32, #tpu.memory_space<vmem>>, vector<1x256xf32>
    %cst_17 = arith.constant dense<0.000000e+00> : vector<16x256xf32>
    %27 = tpu.matmul %24, %25, %cst_17 {dimension_numbers = #tpu.dot_dimension_numbers<[1], [0], [0], [1], [0, 0, 1, 1], [], []>} : vector<16x32xf32>, vector<32x256xf32>, vector<16x256xf32> -> vector<16x256xf32>
    %28 = vector.broadcast %26 : vector<1x256xf32> to vector<16x256xf32>
    %29 = arith.addf %27, %28 : vector<16x256xf32>
    %cst_18 = arith.constant 5.000000e-01 : f32
    %30 = vector.broadcast %cst_18 : f32 to vector<16x256xf32>
    %31 = arith.mulf %30, %29 : vector<16x256xf32>
    %cst_19 = arith.constant 4.471500e-02 : f32
    %32 = vector.broadcast %cst_19 : f32 to vector<16x256xf32>
    %33 = arith.mulf %32, %29 : vector<16x256xf32>
    %34 = arith.mulf %33, %29 : vector<16x256xf32>
    %35 = arith.mulf %34, %29 : vector<16x256xf32>
    %36 = arith.addf %29, %35 : vector<16x256xf32>
    %cst_20 = arith.constant 0.797884583 : f32
    %37 = vector.broadcast %cst_20 : f32 to vector<16x256xf32>
    %38 = arith.mulf %37, %36 : vector<16x256xf32>
    %39 = math.tanh %38 : vector<16x256xf32>
    %cst_21 = arith.constant 1.000000e+00 : f32
    %40 = vector.broadcast %cst_21 : f32 to vector<16x256xf32>
    %41 = arith.addf %40, %39 : vector<16x256xf32>
    %42 = arith.mulf %31, %41 : vector<16x256xf32>
    %c0_22 = arith.constant 0 : index
    %c0_23 = arith.constant 0 : index
    %43 = vector.load %arg6[%c0_22, %c0_23] : memref<257x64xf32, #tpu.memory_space<vmem>>, vector<256x64xf32>
    %c256 = arith.constant 256 : index
    %c0_24 = arith.constant 0 : index
    %44 = vector.load %arg6[%c256, %c0_24] : memref<257x64xf32, #tpu.memory_space<vmem>>, vector<1x64xf32>
    %cst_25 = arith.constant dense<0.000000e+00> : vector<16x64xf32>
    %45 = tpu.matmul %42, %43, %cst_25 {dimension_numbers = #tpu.dot_dimension_numbers<[1], [0], [0], [1], [0, 0, 1, 1], [], []>} : vector<16x256xf32>, vector<256x64xf32>, vector<16x64xf32> -> vector<16x64xf32>
    %46 = vector.broadcast %44 : vector<1x64xf32> to vector<16x64xf32>
    %47 = arith.addf %45, %46 : vector<16x64xf32>
    %48 = tpu.concatenate %23, %47 in 0 : vector<48x64xf32>, vector<16x64xf32> -> vector<64x64xf32>
    %49 = tpu.concatenate %48, %48, %48, %48 in 1 : vector<64x64xf32>, vector<64x64xf32>, vector<64x64xf32>, vector<64x64xf32> -> vector<64x256xf32>
    %c0_26 = arith.constant 0 : index
    %c0_27 = arith.constant 0 : index
    %50 = vector.load %arg1[%c0_26, %c0_27] : memref<1x256xf32, #tpu.memory_space<vmem>>, vector<1x256xf32>
    %51 = vector.broadcast %50 : vector<1x256xf32> to vector<64x256xf32>
    %52 = arith.mulf %49, %51 : vector<64x256xf32>
    %c0_28 = arith.constant 0 : index
    %c0_29 = arith.constant 0 : index
    %53 = vector.load %arg7[%c0_28, %c0_29] : memref<64x256xf32, #tpu.memory_space<vmem>>, vector<64x256xf32>
    tpu.vector_store %arg7[%c0_28, %c0_29], %52 {strides = array<i32>} : memref<64x256xf32, #tpu.memory_space<vmem>>, vector<64x256xf32>,
    return
  }
  func.func @transform_0(%arg0: i32) -> (i32, i32) {
    %c0_i32 = arith.constant 0 : i32
    %c0_i32_0 = arith.constant 0 : i32
    %c0_i32_1 = arith.constant 0 : i32
    return %c0_i32, %c0_i32_0 : i32, i32
  }
  func.func @transform_1(%arg0: i32) -> (i32, i32) {
    %c0_i32 = arith.constant 0 : i32
    %c0_i32_0 = arith.constant 0 : i32
    %c0_i32_1 = arith.constant 0 : i32
    return %c0_i32, %c0_i32_0 : i32, i32
  }
  func.func @transform_2(%arg0: i32) -> (i32, i32) {
    %c0_i32 = arith.constant 0 : i32
    %c0_i32_0 = arith.constant 0 : i32
    %c0_i32_1 = arith.constant 0 : i32
    return %c0_i32, %c0_i32_0 : i32, i32
  }
  func.func @transform_3(%arg0: i32) -> (i32, i32) {
    %c0_i32 = arith.constant 0 : i32
    %c0_i32_0 = arith.constant 0 : i32
    %c0_i32_1 = arith.constant 0 : i32
    return %c0_i32, %c0_i32_0 : i32, i32
  }
  func.func @transform_4(%arg0: i32) -> (i32, i32) {
    %c0_i32 = arith.constant 0 : i32
    %c0_i32_0 = arith.constant 0 : i32
    %c0_i32_1 = arith.constant 0 : i32
    return %c0_i32, %c0_i32_0 : i32, i32
  }
  func.func @transform_5(%arg0: i32) -> (i32, i32) {
    %c0_i32 = arith.constant 0 : i32
    %c0_i32_0 = arith.constant 0 : i32
    %c0_i32_1 = arith.constant 0 : i32
    return %c0_i32, %c0_i32_0 : i32, i32
  }
  func.func @transform_6(%arg0: i32) -> (i32, i32) {
    %c0_i32 = arith.constant 0 : i32
    %c0_i32_0 = arith.constant 0 : i32
    %c0_i32_1 = arith.constant 0 : i32
    return %c0_i32, %c0_i32_0 : i32, i32
  }
}

</mosaic_0001>

<bundles_post_ra>
// kernel: forward.1
= control target key start
LH: loop header
LB: loop body
LE: loop exit
PB: predicated region body
PF: predicated region fallthrough
CT: control target
= control target key end

     0   :  { %v907_v3 = vmov 0.0   ;;  %vm38_vm0 = vcmask 261120   ;;  %s908_s13 = smov 64   ;;  %vm608_vm1 = vcmask 523264   ;;  %s1309_s2 = inlined_call_operand.vmem [shape: f32[33,128], index: 2, kind: input, shape index: {}]   ;;  %s1310_s4 = inlined_call_operand.vmem [shape: f32[33,256], index: 4, kind: input, shape index: {}]   ;;  %s1311_s1 = inlined_call_operand.vmem [shape: f32[64,32], index: 1, kind: input, shape index: {}]   ;;  %s1312_s3 = inlined_call_operand.vmem [shape: f32[129,64], index: 3, kind: input, shape index: {}]   ;;  %s1313_s5 = inlined_call_operand.vmem [shape: f32[257,64], index: 5, kind: input, shape index: {}]   ;;  %s1314_s0 = inlined_call_operand.vmem [shape: f32[1,256], index: 0, kind: input, shape index: {}]   ;;  %s1315_s6 = inlined_call_operand.vmem [shape: f32[64,256], index: 6, kind: output, shape index: {}]  }
   0x1   :  { %v29_v0 = vld [vmem:[%s1309_s2] sm:$0xff]  ;;  %v30_v1 = vld [vmem:[%s1309_s2 + $0x8] sm:$0xff]  ;;  %415 = vmatprep.mubr.f32.mxu0 %v907_v3  ;;  %v327_v5 = vld [vmem:[%s1310_s4 + $0x18] sm:$0xff] }
   0x2   :  { %v325_v2 = vld [vmem:[%s1310_s4 + $0x8] sm:$0xff]  ;;  %v805_v4 = vpack.c.bf16 %v30_v1, %v29_v0  ;;  %v324_v6 = vld [vmem:[%s1310_s4] sm:$0xff]  ;;  %v326_v7 = vld [vmem:[%s1310_s4 + $0x10] sm:$0xff] }
   0x3   :  { %v845_v8 = vpack.c.bf16 %v327_v5, %v325_v2  ;;  %v847_v9 = vpack.c.bf16 %v326_v7, %v324_v6  ;;  %v31_v10 = vld [vmem:[%s1309_s2 + $0x10] sm:$0xff]  ;;  %v32_v11 = vld [vmem:[%s1309_s2 + $0x18] sm:$0xff]  ;;  %v329_v12 = vld [vmem:[%s1310_s4 + $0x28] sm:$0xff] }
   0x4   :  { %806 = vmatprep.subr.bf16.mxu1 %v805_v4  ;;  %v809_v13 = vpack.c.bf16 %v32_v11, %v31_v10  ;;  %v331_v14 = vld [vmem:[%s1310_s4 + $0x38] sm:$0xff]  ;;  %v328_v15 = vld [vmem:[%s1310_s4 + $0x20] sm:$0xff]  ;;  %v330_v16 = vld [vmem:[%s1310_s4 + $0x30] sm:$0xff] }
   0x5   :  { %846 = vmatprep.subr.bf16.mxu0 %v845_v8  ;;  %808 = vmatpush3.bf16.msra.mxu1 %v805_v4  ;;  %v849_v17 = vpack.c.bf16 %v331_v14, %v329_v12  ;;  %v23_v18 = vld [vmem:[%s1311_s1] sm:$0xff]  ;;  %v851_v19 = vpack.c.bf16 %v330_v16, %v328_v15  ;;  %v207_v21 = vld [vmem:[%s1312_s3 + $0x8] sm:$0xff]  ;;  %v322_v29 = vld [vmem:[%s1311_s1 + $0x30] sm:$0xff] }
   0x6   :  { %848 = vmatpush1.bf16.msra.mxu0 %v847_v9  ;;  %810 = vmatprep.subr.bf16.mxu1 %v809_v13  ;;  %v206_v20 = vld [vmem:[%s1312_s3] sm:$0xff]  ;;  %v481_v23 = vld [vmem:[%s1313_s5 + $0x88] sm:$0xff]  ;;  %v25_v30 = vld [vmem:[%s1311_s1 + $0x10] sm:$0xff] }
   0x7   :  { %850 = vmatprep.subr.bf16.mxu0 %v849_v17  ;;  %755 = vmatprep.mubr.msk.f32.mxu1 %vm38_vm0, %v23_v18  ;;  %v480_v22 = vld [vmem:[%s1313_s5 + $0x80] sm:$0xff]  ;;  %v24_v24 = vld [vmem:[%s1311_s1 + $0x8] sm:$0xff]  ;;  %v813_v25 = vpack.c.bf16 %v207_v21, %v206_v20  ;;  %v26_v32 = vld [vmem:[%s1311_s1 + $0x18] sm:$0xff] }
   0x8   :  { %v853_v26 = vpack.c.bf16 %v481_v23, %v480_v22  ;;  %v464_v27 = vld [vmem:[%s1313_s5] sm:$0xff]  ;;  %v465_v28 = vld [vmem:[%s1313_s5 + $0x8] sm:$0xff]  ;;  %v323_v33 = vld [vmem:[%s1311_s1 + $0x38] sm:$0xff] }
   0x9   :  { %812 = vmatpush3.bf16.msra.mxu1 %v809_v13  ;;  %v855_v31 = vpack.c.bf16 %v465_v28, %v464_v27  ;;  %v27_v34 = vld [vmem:[%s1311_s1 + $0x20] sm:$0xff]  ;;  %v28_v35 = vld [vmem:[%s1311_s1 + $0x28] sm:$0xff]  ;;  %v208_v36 = vld [vmem:[%s1312_s3 + $0x10] sm:$0xff] }
   0xa   :  { %852 = vmatpush1.bf16.msra.mxu0 %v851_v19  ;;  %814 = vmatprep.subr.bf16.mxu1 %v813_v25  ;;  %v209_v37 = vld [vmem:[%s1312_s3 + $0x18] sm:$0xff]  ;;  %v482_v39 = vld [vmem:[%s1313_s5 + $0x90] sm:$0xff]  ;;  %v210_v45 = vld [vmem:[%s1312_s3 + $0x20] sm:$0xff] }
   0xb   :  { %854 = vmatprep.subr.bf16.mxu0 %v853_v26  ;;  %v817_v38 = vpack.c.bf16 %v209_v37, %v208_v36  ;;  %v483_v40 = vld [vmem:[%s1313_s5 + $0x98] sm:$0xff]  ;;  %v466_v41 = vld [vmem:[%s1313_s5 + $0x10] sm:$0xff]  ;;  %v211_v46 = vld [vmem:[%s1312_s3 + $0x28] sm:$0xff] }
   0xc   :  { %756 = vmatmul.mubr.msk.f32.vlgmr.msra.gmra.mrb[0].mxu1 %vm38_vm0, %v24_v24  ;;  %v857_v42 = vpack.c.bf16 %v483_v40, %v482_v39  ;;  %v467_v43 = vld [vmem:[%s1313_s5 + $0x18] sm:$0xff]  ;;  %v484_v47 = vld [vmem:[%s1313_s5 + $0xa0] sm:$0xff]  ;;  %v821_v48 = vpack.c.bf16 %v211_v46, %v210_v45  ;;  %v485_v49 = vld [vmem:[%s1313_s5 + $0xa8] sm:$0xff] }
   0xd   :  { %674 = vmatmul.mubr.msk.f32.vlgmr.msra.gmra.mrb[0].mxu0 %vm38_vm0, %v322_v29  ;;  %758 = vmatprep.mubr.msk.f32.mxu1 %vm38_vm0, %v25_v30  ;;  %v859_v44 = vpack.c.bf16 %v467_v43, %v466_v41  ;;  %v468_v50 = vld [vmem:[%s1313_s5 + $0x20] sm:$0xff]  ;;  %v469_v51 = vld [vmem:[%s1313_s5 + $0x28] sm:$0xff]  ;;  %v861_v52 = vpack.c.bf16 %v485_v49, %v484_v47  ;;  %v212_v54 = vld [vmem:[%s1312_s3 + $0x30] sm:$0xff] }
   0xe   :  { %421 = vmatprep.mubr.f32.mxu0 %v907_v3  ;;  %816 = vmatpush3.bf16.msra.mxu1 %v813_v25  ;;  %v863_v53 = vpack.c.bf16 %v469_v51, %v468_v50  ;;  %v213_v55 = vld [vmem:[%s1312_s3 + $0x38] sm:$0xff]  ;;  %v486_v56 = vld [vmem:[%s1313_s5 + $0xb0] sm:$0xff]  ;;  %v214_v63 = vld [vmem:[%s1312_s3 + $0x40] sm:$0xff] }
   0xf   :  { %856 = vmatpush3.bf16.msra.mxu0 %v855_v31  ;;  %818 = vmatprep.subr.bf16.mxu1 %v817_v38  ;;  %v825_v57 = vpack.c.bf16 %v213_v55, %v212_v54  ;;  %v487_v58 = vld [vmem:[%s1313_s5 + $0xb8] sm:$0xff]  ;;  %v470_v59 = vld [vmem:[%s1313_s5 + $0x30] sm:$0xff]  ;;  %v215_v0 = vld [vmem:[%s1312_s3 + $0x48] sm:$0xff] }
  0x10   :  { %759 = vmatmul.mubr.msk.f32.gmra.mrb[2].mxu1 %vm38_vm0, %v26_v32  ;;  %858 = vmatprep.subr.bf16.mxu0 %v857_v42  ;;  %v471_v60 = vld [vmem:[%s1313_s5 + $0x38] sm:$0xff]  ;;  %v865_v61 = vpack.c.bf16 %v487_v58, %v486_v56  ;;  %v488_v1 = vld [vmem:[%s1313_s5 + $0xc0] sm:$0xff]  ;;  %v829_v2 = vpack.c.bf16 %v215_v0, %v214_v63  ;;  %v489_v3 = vld [vmem:[%s1313_s5 + $0xc8] sm:$0xff] }
  0x11   :  { %675 = vmatmul.mubr.msk.f32.gmra.mrb[2].mxu0 %vm38_vm0, %v323_v33  ;;  %761 = vmatprep.mubr.msk.f32.mxu1 %vm38_vm0, %v27_v34  ;;  %v867_v62 = vpack.c.bf16 %v471_v60, %v470_v59  ;;  %v472_v4 = vld [vmem:[%s1313_s5 + $0x40] sm:$0xff]  ;;  %v473_v5 = vld [vmem:[%s1313_s5 + $0x48] sm:$0xff]  ;;  %v869_v6 = vpack.c.bf16 %v489_v3, %v488_v1  ;;  %v216_v8 = vld [vmem:[%s1312_s3 + $0x50] sm:$0xff] }
  0x12   :  { %820 = vmatpush3.bf16.msra.mxu1 %v817_v38  ;;  %v871_v7 = vpack.c.bf16 %v473_v5, %v472_v4  ;;  %v217_v9 = vld [vmem:[%s1312_s3 + $0x58] sm:$0xff]  ;;  %v490_v11 = vld [vmem:[%s1313_s5 + $0xd0] sm:$0xff]  ;;  %v218_v16 = vld [vmem:[%s1312_s3 + $0x60] sm:$0xff] }
  0x13   :  { %860 = vmatpush3.bf16.msra.mxu0 %v859_v44  ;;  %822 = vmatprep.subr.bf16.mxu1 %v821_v48  ;;  %v833_v10 = vpack.c.bf16 %v217_v9, %v216_v8  ;;  %v491_v12 = vld [vmem:[%s1313_s5 + $0xd8] sm:$0xff]  ;;  %v474_v13 = vld [vmem:[%s1313_s5 + $0x50] sm:$0xff]  ;;  %v219_v17 = vld [vmem:[%s1312_s3 + $0x68] sm:$0xff] }
  0x14   :  { %762 = vmatmul.mubr.msk.f32.gmra.mrb[4].mxu1 %vm38_vm0, %v28_v35  ;;  %862 = vmatprep.subr.bf16.mxu0 %v861_v52  ;;  %v873_v14 = vpack.c.bf16 %v491_v12, %v490_v11  ;;  %v475_v15 = vld [vmem:[%s1313_s5 + $0x58] sm:$0xff]  ;;  %v837_v19 = vpack.c.bf16 %v219_v17, %v218_v16  ;;  %v492_v20 = vld [vmem:[%s1313_s5 + $0xe0] sm:$0xff]  ;;  %v493_v21 = vld [vmem:[%s1313_s5 + $0xe8] sm:$0xff]  ;;  %v335_v35 = vlaneseq }
  0x15   :  { %v875_v18 = vpack.c.bf16 %v475_v15, %v474_v13  ;;  %v476_v22 = vld [vmem:[%s1313_s5 + $0x60] sm:$0xff]  ;;  %v877_v23 = vpack.c.bf16 %v493_v21, %v492_v20  ;;  %v477_v24 = vld [vmem:[%s1313_s5 + $0x68] sm:$0xff]  ;;  %v220_v25 = vld [vmem:[%s1312_s3 + $0x70] sm:$0xff] }
  0x16   :  { %824 = vmatpush3.bf16.msra.mxu1 %v821_v48  ;;  %v221_v26 = vld [vmem:[%s1312_s3 + $0x78] sm:$0xff]  ;;  %v494_v27 = vld [vmem:[%s1313_s5 + $0xf0] sm:$0xff]  ;;  %v879_v29 = vpack.c.bf16 %v477_v24, %v476_v22  ;;  %v1156_v36 = vshrl.u32 %v335_v35, 7  ;;  %v673_v38 = vld [vmem:[%s1310_s4 + $0x40] ss:$8 sm:$0x3] }
  0x17   :  { %864 = vmatpush3.bf16.msra.mxu0 %v863_v53  ;;  %826 = vmatprep.subr.bf16.mxu1 %v825_v57  ;;  %v495_v28 = vld [vmem:[%s1313_s5 + $0xf8] sm:$0xff]  ;;  %v841_v30 = vpack.c.bf16 %v221_v26, %v220_v25  ;;  %v478_v32 = vld [vmem:[%s1313_s5 + $0x70] sm:$0xff]  ;;  %v665_v40 = vld [vmem:[%s1309_s2 + $0x20] ss:$0 sm:$0xff] }
  0x18   :  { %866 = vmatprep.subr.bf16.mxu0 %v865_v61  ;;  %v881_v31 = vpack.c.bf16 %v495_v28, %v494_v27  ;;  %v479_v33 = vld [vmem:[%s1313_s5 + $0x78] sm:$0xff]  ;;  %v337_v37 = vsub.s32 0, %v1156_v36  ;;  %v341_v39 = vsub.s32 1, %v1156_v36 }
  0x19   :  { %v883_v34 = vpack.c.bf16 %v479_v33, %v478_v32 }
  0x1a   :  { %828 = vmatpush3.bf16.msra.mxu1 %v825_v57  ;;  %v338_v41 = vrot.slane %v673_v38, %v337_v37  ;;  %v342_v42 = vrot.slane %v673_v38, %v341_v39 }
  0x1b   :  { %868 = vmatpush3.bf16.msra.mxu0 %v867_v62  ;;  %830 = vmatprep.subr.bf16.mxu1 %v829_v2 }
  0x1c   :  { %870 = vmatprep.subr.bf16.mxu0 %v869_v6 }
  0x1e   :  { %832 = vmatpush3.bf16.msra.mxu1 %v829_v2 }
  0x1f   :  { %872 = vmatpush3.bf16.msra.mxu0 %v871_v7  ;;  %834 = vmatprep.subr.bf16.mxu1 %v833_v10 }
  0x20   :  { %874 = vmatprep.subr.bf16.mxu0 %v873_v14 }
  0x22   :  { %836 = vmatpush3.bf16.msra.mxu1 %v833_v10 }
  0x23   :  { %876 = vmatpush3.bf16.msra.mxu0 %v875_v18  ;;  %838 = vmatprep.subr.bf16.mxu1 %v837_v19 }
  0x24   :  { %878 = vmatprep.subr.bf16.mxu0 %v877_v23 }
  0x26   :  { %840 = vmatpush3.bf16.msra.mxu1 %v837_v19 }
  0x27   :  { %880 = vmatpush3.bf16.msra.mxu0 %v879_v29  ;;  %842 = vmatprep.subr.bf16.mxu1 %v841_v30 }
  0x28   :  { %882 = vmatprep.subr.bf16.mxu0 %v881_v31 }
  0x2a   :  { %844 = vmatpush3.bf16.msra.mxu1 %v841_v30 }
  0x2b   :  { %884 = vmatpush3.bf16.msra.mxu0 %v883_v34 }
  0xdf   :  { %v757_v43 = vpop.f32.mrb[0].mxu1 }
  0xe0   :  { %v1170_v44 = vadd.f32 %v757_v43, %v665_v40  ;;  %v417_v45 = vpop.f32.mrb[0].mxu0  ;;  %v123_v46 = vpop.f32.mrb[1].mxu1 }
  0xe1   :  { %v1172_v47 = vadd.f32 %v417_v45, %v338_v41  ;;  %v1174_v48 = vadd.f32 %v665_v40, %v123_v46  ;;  %v419_v49 = vpop.f32.mrb[1].mxu0 }
  0xe2   :  { %v159_v50 = vmul.f32 0.044715, %v1170_v44  ;;  %v1177_v51 = vadd.f32 %v419_v49, %v342_v42 }
  0xe3   :  { %v432_v52 = vmul.f32 0.044715, %v1172_v47  ;;  %v158_v53 = vmul.f32 0.044715, %v1174_v48  ;;  %v760_v54 = vpop.f32.mrb[2].mxu1 }
  0xe4   :  { %v165_v55 = vmul.f32 %v159_v50, %v1170_v44  ;;  %v433_v56 = vmul.f32 0.044715, %v1177_v51  ;;  %v1183_v57 = vadd.f32 %v760_v54, %v665_v40  ;;  %v423_v58 = vpop.f32.mrb[2].mxu0  ;;  %v133_v59 = vpop.f32.mrb[3].mxu1 }
  0xe5   :  { %v436_v60 = vmul.f32 %v432_v52, %v1172_v47  ;;  %v164_v61 = vmul.f32 %v158_v53, %v1174_v48  ;;  %v1187_v62 = vadd.f32 %v423_v58, %v338_v41  ;;  %v1189_v63 = vadd.f32 %v665_v40, %v133_v59  ;;  %v425_v0 = vpop.f32.mrb[3].mxu0 }
  0xe6   :  { %v171_v1 = vmul.f32 %v165_v55, %v1170_v44  ;;  %v437_v2 = vmul.f32 %v433_v56, %v1177_v51  ;;  %v1193_v3 = vadd.f32 %v425_v0, %v342_v42  ;;  %v161_v5 = vmul.f32 0.044715, %v1183_v57 }
  0xe7   :  { %v440_v4 = vmul.f32 %v436_v60, %v1172_v47  ;;  %v160_v6 = vmul.f32 0.044715, %v1189_v63  ;;  %v763_v7 = vpop.f32.mrb[4].mxu1  ;;  %v170_v8 = vmul.f32 %v164_v61, %v1174_v48  ;;  %v434_v10 = vmul.f32 0.044715, %v1187_v62 }
  0xe8   :  { %v177_v9 = vadd.f32 %v171_v1, %v1170_v44  ;;  %v435_v11 = vmul.f32 0.044715, %v1193_v3  ;;  %v1202_v12 = vadd.f32 %v763_v7, %v665_v40  ;;  %v143_v13 = vpop.f32.mrb[5].mxu1  ;;  %v167_v22 = vmul.f32 %v161_v5, %v1183_v57 }
  0xe9   :  { %v444_v14 = vadd.f32 %v440_v4, %v1172_v47  ;;  %v166_v15 = vmul.f32 %v160_v6, %v1189_v63  ;;  %v1206_v16 = vadd.f32 %v665_v40, %v143_v13  ;;  %v176_v20 = vadd.f32 %v170_v8, %v1174_v48 }
  0xea   :  { %v183_v17 = vmul.f32 0.7978846, %v177_v9  ;;  %v439_v18 = vmul.f32 %v435_v11, %v1193_v3  ;;  %v163_v19 = vmul.f32 0.044715, %v1202_v12  ;;  %v441_v24 = vmul.f32 %v437_v2, %v1177_v51 }
  0xeb   :  { %v448_v21 = vmul.f32 0.7978846, %v444_v14  ;;  %v162_v23 = vmul.f32 0.044715, %v1206_v16  ;;  %v438_v25 = vmul.f32 %v434_v10, %v1187_v62  ;;  %v182_v26 = vmul.f32 0.7978846, %v176_v20 }
  0xec   :  { %887 = vtanh.f32 %v183_v17  ;;  %v445_v28 = vadd.f32 %v441_v24, %v1177_v51  ;;  %v172_v29 = vmul.f32 %v166_v15, %v1189_v63  ;;  %v169_v30 = vmul.f32 %v163_v19, %v1202_v12 }
  0xed   :  { %889 = vtanh.f32 %v448_v21  ;;  %v168_v27 = vmul.f32 %v162_v23, %v1206_v16  ;;  %v443_v31 = vmul.f32 %v439_v18, %v1193_v3  ;;  %v173_v34 = vmul.f32 %v167_v22, %v1183_v57 }
  0xee   :  { %891 = vtanh.f32 %v182_v26  ;;  %v449_v32 = vmul.f32 0.7978846, %v445_v28  ;;  %v178_v33 = vadd.f32 %v172_v29, %v1189_v63  ;;  %v442_v38 = vmul.f32 %v438_v25, %v1187_v62 }
  0xef   :  { %v447_v35 = vadd.f32 %v443_v31, %v1193_v3  ;;  %v174_v40 = vmul.f32 %v168_v27, %v1206_v16  ;;  %v179_v42 = vadd.f32 %v173_v34, %v1183_v57  ;;  %v175_v49 = vmul.f32 %v169_v30, %v1202_v12 }
  0xf0   :  { %893 = vtanh.f32 %v449_v32  ;;  %v184_v41 = vmul.f32 0.7978846, %v178_v33  ;;  %v446_v45 = vadd.f32 %v442_v38, %v1187_v62  ;;  %v152_v61 = vmul.f32 0.5, %v1174_v48 }
  0xf1   :  { %v451_v43 = vmul.f32 0.7978846, %v447_v35  ;;  %v180_v46 = vadd.f32 %v174_v40, %v1206_v16  ;;  %v185_v50 = vmul.f32 0.7978846, %v179_v42  ;;  %v181_v54 = vadd.f32 %v175_v49, %v1202_v12 }
  0xf2   :  { %895 = vtanh.f32 %v184_v41  ;;  %v450_v52 = vmul.f32 0.7978846, %v446_v45  ;;  %v153_v1 = vmul.f32 0.5, %v1170_v44  ;;  %v429_v6 = vmul.f32 0.5, %v1177_v51 }
  0xf3   :  { %897 = vtanh.f32 %v451_v43  ;;  %v186_v53 = vmul.f32 0.7978846, %v180_v46  ;;  %v187_v56 = vmul.f32 0.7978846, %v181_v54  ;;  %v428_v10 = vmul.f32 0.5, %v1172_v47 }
  0xf4   :  { %899 = vtanh.f32 %v185_v50  ;;  %v154_v14 = vmul.f32 0.5, %v1189_v63  ;;  %v431_v44 = vmul.f32 0.5, %v1193_v3  ;;  %v155_v20 = vmul.f32 0.5, %v1183_v57 }
  0xf5   :  { %901 = vtanh.f32 %v450_v52  ;;  %v430_v23 = vmul.f32 0.5, %v1187_v62  ;;  %v156_v26 = vmul.f32 0.5, %v1206_v16  ;;  %v157_v57 = vmul.f32 0.5, %v1202_v12  ;;  %v672_v62 = vld [vmem:[%s1312_s3 + $0x80] ss:$0 sm:$0xff] }
  0xf6   :  { %v888_v55 = vpop.eup %887  ;;  %903 = vtanh.f32 %v186_v53  ;;  %v676_v53 = vld [vmem:[%s1313_s5 + $0x100] ss:$0 sm:$0xff] }
  0xf7   :  { %v890_v58 = vpop.eup %889  ;;  %v195_v60 = vadd.f32 1.0, %v888_v55  ;;  %905 = vtanh.f32 %v187_v56 }
  0xf8   :  { %v892_v59 = vpop.eup %891  ;;  %v456_v5 = vadd.f32 1.0, %v890_v58  ;;  %v617_v58 = vld [vmem:[%s1314_s0] sm:$0x3] }
  0xf9   :  { %v194_v0 = vadd.f32 1.0, %v892_v59  ;;  %v201_v8 = vmul.f32 %v195_v60, %v153_v1  ;;  %v622_v59 = vrot.slane %v617_v58, %v337_v37  ;;  %v626_v60 = vrot.slane %v617_v58, %v341_v39 }
  0xfa   :  { %v894_v2 = vpop.eup %893  ;;  %v460_v17 = vmul.f32 %v456_v5, %v428_v10 }
  0xfb   :  { %v200_v4 = vmul.f32 %v194_v0, %v152_v61  ;;  %v457_v7 = vadd.f32 1.0, %v894_v2 }
  0xfc   :  { %v896_v9 = vpop.eup %895 }
  0xfd   :  { %796 = vmatprep.mubr.f32.mxu1 %v200_v4  ;;  %v898_v11 = vpop.eup %897  ;;  %v461_v13 = vmul.f32 %v457_v7, %v429_v6  ;;  %v196_v48 = vadd.f32 1.0, %v896_v9 }
  0xfe   :  { %797 = vmatmul.mubr.f32.vlgmr.msra.gmra.mrb[6].mxu1 %v201_v8  ;;  %v900_v15 = vpop.eup %899  ;;  %v459_v18 = vadd.f32 1.0, %v898_v11 }
  0xff   :  { %v902_v19 = vpop.eup %901  ;;  %565 = vmatprep.mubr.f32.mxu0 %v461_v13  ;;  %v202_v51 = vmul.f32 %v196_v48, %v154_v14  ;;  %v197_v21 = vadd.f32 1.0, %v900_v15 }
 0x100   :  { %v904_v22 = vpop.eup %903  ;;  %566 = vmatmul.mubr.f32.vlgmr.msra.gmra.mrb[4].mxu0 %v460_v17  ;;  %v463_v47 = vmul.f32 %v459_v18, %v431_v44  ;;  %v458_v24 = vadd.f32 1.0, %v902_v19 }
 0x101   :  { %v906_v25 = vpop.eup %905  ;;  %799 = vmatprep.mubr.f32.mxu1 %v202_v51  ;;  %v203_v63 = vmul.f32 %v197_v21, %v155_v20  ;;  %v198_v27 = vadd.f32 1.0, %v904_v22 }
 0x102   :  { %570 = vmatprep.mubr.f32.mxu0 %v463_v47  ;;  %v462_v3 = vmul.f32 %v458_v24, %v430_v23  ;;  %v199_v28 = vadd.f32 1.0, %v906_v25 }
 0x103   :  { %800 = vmatmul.mubr.f32.gmra.mrb[8].mxu1 %v203_v63  ;;  %v204_v29 = vmul.f32 %v198_v27, %v156_v26 }
 0x104   :  { %571 = vmatmul.mubr.f32.gmra.mrb[6].mxu0 %v462_v3  ;;  %v205_v30 = vmul.f32 %v199_v28, %v157_v57 }
 0x105   :  { %802 = vmatprep.mubr.f32.mxu1 %v204_v29 }
 0x107   :  { %803 = vmatmul.mubr.f32.gmra.mrb[10].mxu1 %v205_v30 }
 0x1d1   :  { %v798_v31 = vpop.f32.mrb[6].mxu1 }
 0x1d2   :  { %v299_v32 = vadd.f32 %v798_v31, %v672_v62  ;;  %v293_v33 = vpop.f32.mrb[7].mxu1 }
 0x1d3   :  { %v741_v16 = vpop.f32.mrb[4].mxu0  ;;  %v294_v35 = vadd.f32 %v672_v62, %v293_v33 }
 0x1d4   :  { %586 = vrot.lane.b32.xlu0 %v299_v32, %s908_s13  ;;  %v742_v34 = vpop.f32.mrb[5].mxu0 }
 0x1d5   :  { %v743_v38 = vadd.f32 %v742_v34, %v741_v16 }
 0x1d6   :  { %v801_v40 = vpop.f32.mrb[8].mxu1 }
 0x1d7   :  { %v309_v41 = vadd.f32 %v801_v40, %v672_v62  ;;  %v744_v12 = vpop.f32.mrb[6].mxu0  ;;  %v303_v42 = vpop.f32.mrb[9].mxu1  ;;  %v568_v55 = vadd.f32 %v743_v38, %v676_v53 }
 0x1d8   :  { %584 = vrot.lane.b32.xlu0 %v294_v35, %s908_s13  ;;  %v745_v43 = vpop.f32.mrb[7].mxu0  ;;  %v304_v49 = vadd.f32 %v672_v62, %v303_v42 }
 0x1d9   :  { %v746_v45 = vadd.f32 %v745_v43, %v744_v12  ;;  %590 = vrot.lane.b32.xlu1 %v309_v41, %s908_s13 }
 0x1da   :  { %v804_v46 = vpop.f32.mrb[10].mxu1 }
 0x1db   :  { %v313_v50 = vpop.f32.mrb[11].mxu1  ;;  %v319_v54 = vadd.f32 %v804_v46, %v672_v62  ;;  %v573_v56 = vadd.f32 %v746_v45, %v676_v53 }
 0x1dc   :  { %v314_v52 = vadd.f32 %v672_v62, %v313_v50 }
 0x1dd   :  { %588 = vrot.lane.b32.xlu1 %v304_v49, %s908_s13 }
 0x1de   :  { %592 = vrot.lane.b32.xlu0 %v314_v52, %s908_s13 }
 0x1e1   :  { %594 = vrot.lane.b32.xlu1 %v319_v54, %s908_s13 }
 0x1e2   :  { %596 = vrot.lane.b32.xlu0 %v568_v55, %s908_s13 }
 0x1e5   :  { %598 = vrot.lane.b32.xlu1 %v573_v56, %s908_s13 }
 0x246   :  { %v587_v61 = vpop.permute.xlu0 %586 }
 0x247   :  { %v610_v0 = vsel %vm608_vm1, %v299_v32, %v587_v61 }
 0x248   :  { %v631_v1 = vmul.f32 %v622_v59, %v610_v0  ;;  %v632_v2 = vmul.f32 %v626_v60, %v610_v0 }
 0x24a   :  { %647 = vst [vmem:[%s1315_s6 + $0x10] sm:$0xff] %v631_v1  ;;  %648 = vst [vmem:[%s1315_s6 + $0x18] sm:$0xff] %v632_v2  ;;  %v585_v4 = vpop.permute.xlu0 %584 }
 0x24b   :  { %v609_v37 = vsel %vm608_vm1, %v294_v35, %v585_v4  ;;  %v591_v5 = vpop.permute.xlu1 %590 }
 0x24c   :  { %v629_v36 = vmul.f32 %v622_v59, %v609_v37  ;;  %v630_v39 = vmul.f32 %v626_v60, %v609_v37  ;;  %v612_v6 = vsel %vm608_vm1, %v309_v41, %v591_v5 }
 0x24d   :  { %v635_v7 = vmul.f32 %v622_v59, %v612_v6  ;;  %v636_v8 = vmul.f32 %v626_v60, %v612_v6 }
 0x24e   :  { %645 = vst [vmem:[%s1315_s6] sm:$0xff] %v629_v36  ;;  %646 = vst [vmem:[%s1315_s6 + $0x8] sm:$0xff] %v630_v39 }
 0x24f   :  { %651 = vst [vmem:[%s1315_s6 + $0x30] sm:$0xff] %v635_v7  ;;  %652 = vst [vmem:[%s1315_s6 + $0x38] sm:$0xff] %v636_v8  ;;  %v589_v9 = vpop.permute.xlu1 %588 }
 0x250   :  { %v611_v10 = vsel %vm608_vm1, %v304_v49, %v589_v9  ;;  %v593_v11 = vpop.permute.xlu0 %592 }
 0x251   :  { %v633_v13 = vmul.f32 %v622_v59, %v611_v10  ;;  %v634_v14 = vmul.f32 %v626_v60, %v611_v10  ;;  %v613_v48 = vsel %vm608_vm1, %v314_v52, %v593_v11 }
 0x252   :  { %v637_v15 = vmul.f32 %v622_v59, %v613_v48  ;;  %v638_v17 = vmul.f32 %v626_v60, %v613_v48 }
 0x253   :  { %649 = vst [vmem:[%s1315_s6 + $0x20] sm:$0xff] %v633_v13  ;;  %650 = vst [vmem:[%s1315_s6 + $0x28] sm:$0xff] %v634_v14  ;;  %v595_v44 = vpop.permute.xlu1 %594 }
 0x254   :  { %653 = vst [vmem:[%s1315_s6 + $0x40] sm:$0xff] %v637_v15  ;;  %654 = vst [vmem:[%s1315_s6 + $0x48] sm:$0xff] %v638_v17  ;;  %v614_v18 = vsel %vm608_vm1, %v319_v54, %v595_v44  ;;  %v597_v19 = vpop.permute.xlu0 %596 }
 0x255   :  { %v639_v51 = vmul.f32 %v622_v59, %v614_v18  ;;  %v640_v20 = vmul.f32 %v626_v60, %v614_v18  ;;  %v615_v21 = vsel %vm608_vm1, %v568_v55, %v597_v19 }
 0x256   :  { %v641_v22 = vmul.f32 %v622_v59, %v615_v21  ;;  %v642_v47 = vmul.f32 %v626_v60, %v615_v21 }
 0x257   :  { %655 = vst [vmem:[%s1315_s6 + $0x50] sm:$0xff] %v639_v51  ;;  %656 = vst [vmem:[%s1315_s6 + $0x58] sm:$0xff] %v640_v20  ;;  %v599_v23 = vpop.permute.xlu1 %598 }
 0x258   :  { %657 = vst [vmem:[%s1315_s6 + $0x60] sm:$0xff] %v641_v22  ;;  %658 = vst [vmem:[%s1315_s6 + $0x68] sm:$0xff] %v642_v47  ;;  %v616_v24 = vsel %vm608_vm1, %v573_v56, %v599_v23 }
 0x259   :  { %v643_v25 = vmul.f32 %v622_v59, %v616_v24  ;;  %v644_v63 = vmul.f32 %v626_v60, %v616_v24 }
 0x25b   :  { %659 = vst [vmem:[%s1315_s6 + $0x70] sm:$0xff] %v643_v25  ;;  %660 = vst [vmem:[%s1315_s6 + $0x78] sm:$0xff] %v644_v63 }

</bundles_post_ra>
